<compile_context>
chip_gen: v6e
topology: v6e:2x2x1
jax: 0.10.0
libtpu: 0.0.40
codegen_flags: <defaults>
</compile_context>

<pallas_src>
import functools

import jax
import jax.numpy as jnp
import numpy as np
from jax.experimental import pallas as pl
from jax.experimental.pallas import tpu as pltpu


# ---------------------------------------------------------------------------
# Pallas kernel: relu(x * scale + bias)  ->  'same' conv (one banded matmul) + bias
# ---------------------------------------------------------------------------
def _batchconvstyle_kernel(x_ref, scale_ref, bias_ref, bw_ref, cb_ref,
                           out_ref, ypad_ref, *, sz, pad):
    H = x_ref.shape[1]          # rows per sample
    WC = x_ref.shape[2]         # W * Cin  (lane-dense)

    # Folded BatchNorm affine + per-sample style bias + ReLU.
    # f32 elementwise (safe on v5e: no bf16 VPU); x arrives already quantized bf16.
    y = x_ref[0].astype(jnp.float32) * scale_ref[...] + bias_ref[0]
    y = jnp.maximum(y, 0.0)

    # Row-zero-padded activation in VMEM (bf16 for the MXU).
    # Zero ONLY the pad halo rows; the interior is fully overwritten below.
    # (Done every grid step so it is correct regardless of megacore partitioning.)
    ypad_ref[:pad, :] = jnp.zeros((pad, WC), ypad_ref.dtype)
    ypad_ref[pad + H:2 * pad + H, :] = jnp.zeros((pad, WC), ypad_ref.dtype)
    ypad_ref[pad:pad + H, :] = y.astype(ypad_ref.dtype)

    # Single fused matmul: the sz row-shifted windows are concatenated along the
    # lane (K) dim, so K = sz*W*Cin and accumulation happens inside the MXU.
    # TODO(synk): the interior-row VMEM round-trip could be removed entirely with
    #             sublane rolls + halo masking; kept as a scratch for robustness.
    lhs = jnp.concatenate([ypad_ref[ky:ky + H, :] for ky in range(sz)], axis=-1)
    acc = jnp.dot(lhs, bw_ref[...], preferred_element_type=jnp.float32)

    out_ref[0] = acc + cb_ref[...]          # lane-dense (H, W*Cout) store


# ---------------------------------------------------------------------------
# Weight preparation: HWIO conv weight -> banded row-matmul weight (done once)
# ---------------------------------------------------------------------------
def make_banded_weight(w_hwio, w_img):
    """(sz, sz, Cin, Cout) -> (sz*W*Cin, W*Cout), bf16.

    bw[ky*W*Cin + (wo + kx - pad)*Cin + ci, wo*Cout + co] = w[ky, kx, ci, co]
    (entries whose input column falls outside [0, W) stay zero -> column part of
    the 'same' zero padding).
    """
    sz, _, cin, cout = w_hwio.shape
    pad = sz // 2
    w_np = np.asarray(w_hwio, np.float32)
    bw = np.zeros((sz, w_img * cin, w_img * cout), np.float32)
    for ky in range(sz):
        for kx in range(sz):
            for wo in range(w_img):
                wi = wo + kx - pad
                if 0 <= wi < w_img:
                    bw[ky, wi * cin:(wi + 1) * cin,
                       wo * cout:(wo + 1) * cout] = w_np[ky, kx]
    return jnp.asarray(bw.reshape(sz * w_img * cin, w_img * cout), jnp.bfloat16)


# ---------------------------------------------------------------------------
# Forward wrapper (x, output NHWC)
# ---------------------------------------------------------------------------
@jax.jit
def batchconvstyle_apply(params, style, x):
    N, H, W, Cin = x.shape
    sz = params["w"].shape[0]
    Cout = params["w"].shape[3]
    pad = sz // 2
    WC, WCo = W * Cin, W * Cout
    assert sz % 2 == 1, "padding=sz//2 only matches PyTorch 'same' for odd sz"

    # Tiny per-channel / per-sample prep (style linear + BN fold), done in XLA.
    scale = params["gamma"] * jax.lax.rsqrt(params["rvar"] + 1e-5)      # (Cin,)
    shift = params["beta"] - params["rmean"] * scale                    # (Cin,)
    feat = style @ params["lw"] + params["lb"]                          # (N, Cin)
    bias_eff = feat * scale + shift                                     # (N, Cin)

    scale_t = jnp.tile(scale.reshape(1, Cin), (1, W))                   # (1, WC)
    bias_t = jnp.tile(bias_eff, (1, W)).reshape(N, 1, WC)               # (N, 1, WC)
    cb_t = jnp.tile(params["b"].reshape(1, Cout), (1, W))               # (1, WCo)

    # bf16 activation I/O (largest HBM transfer); MXU operands are bf16 anyway.
    x_wide = x.reshape(N, H, WC).astype(jnp.bfloat16)

    flops = 2 * N * H * (sz * WC) * WCo
    bytes_accessed = (2 * x_wide.size + 2 * params["bw"].size
                      + 4 * (scale_t.size + bias_t.size + cb_t.size + N * H * WCo))

    kernel = functools.partial(_batchconvstyle_kernel, sz=sz, pad=pad)
    out_wide = pl.pallas_call(
        kernel,
        out_shape=jax.ShapeDtypeStruct((N, H, WCo), jnp.float32),
        grid_spec=pltpu.PrefetchScalarGridSpec(
            num_scalar_prefetch=0,
            grid=(N,),
            in_specs=[
                pl.BlockSpec((1, H, WC), lambda n: (n, 0, 0)),     # x (per sample)
                pl.BlockSpec((1, WC), lambda n: (0, 0)),           # scale (resident)
                pl.BlockSpec((1, 1, WC), lambda n: (n, 0, 0)),     # per-sample bias
                pl.BlockSpec((sz * WC, WCo), lambda n: (0, 0)),    # banded W (resident)
                pl.BlockSpec((1, WCo), lambda n: (0, 0)),          # conv bias (resident)
            ],
            out_specs=pl.BlockSpec((1, H, WCo), lambda n: (n, 0, 0)),
            scratch_shapes=[pltpu.VMEM((H + 2 * pad, WC), jnp.bfloat16)],
        ),
        compiler_params=pltpu.CompilerParams(
            dimension_semantics=("parallel",)),
        cost_estimate=pl.CostEstimate(flops=flops, transcendentals=0,
                                      bytes_accessed=bytes_accessed),
    )(x_wide, scale_t, bias_t, params["bw"], cb_t)

    return out_wide.reshape(N, H, W, Cout)


# ---------------------------------------------------------------------------
# Deterministic synthetic parameters
# ---------------------------------------------------------------------------
def make_params(key, cin, cout, style_channels, sz):
    ks = jax.random.split(key, 8)
    return dict(
        gamma=1.0 + 0.1 * jax.random.normal(ks[0], (cin,), jnp.float32),
        beta=0.1 * jax.random.normal(ks[1], (cin,), jnp.float32),
        rmean=0.1 * jax.random.normal(ks[2], (cin,), jnp.float32),
        rvar=1.0 + 0.1 * jax.random.uniform(ks[3], (cin,), jnp.float32),
        w=0.1 * jax.random.normal(ks[4], (sz, sz, cin, cout), jnp.float32),   # HWIO
        b=0.1 * jax.random.normal(ks[5], (cout,), jnp.float32),
        # nn.Linear(style_channels, out_channels); stored transposed (S, C).
        # The module's `x + feat` broadcast requires in_channels == out_channels.
        lw=0.1 * jax.random.normal(ks[6], (style_channels, cin), jnp.float32),
        lb=0.1 * jax.random.normal(ks[7], (1, cin), jnp.float32),
    )


# ---------------------------------------------------------------------------
# Pure-JAX references (lax.conv) for numerical validation
# ---------------------------------------------------------------------------
def ref_batchconvstyle(params, style, x, *, conv_dtype=jnp.float32,
                       quantize_input=False):
    eps = 1e-5
    if quantize_input:   # match the kernel's bf16 activation input
        x = x.astype(jnp.bfloat16).astype(jnp.float32)
    feat = style @ params["lw"] + params["lb"]                         # (N, Cin)
    y = x + feat[:, None, None, :]
    y = ((y - params["rmean"]) * jax.lax.rsqrt(params["rvar"] + eps)
         * params["gamma"] + params["beta"])
    y = jnp.maximum(y, 0.0)
    sz = params["w"].shape[0]
    pad = sz // 2
    out = jax.lax.conv_general_dilated(
        y.astype(conv_dtype), params["w"].astype(conv_dtype),
        window_strides=(1, 1), padding=[(pad, pad), (pad, pad)],
        dimension_numbers=("NHWC", "HWIO", "NHWC"),
        preferred_element_type=jnp.float32)
    return out + params["b"].reshape(1, 1, 1, -1)


# ---------------------------------------------------------------------------
if __name__ == "__main__":
    # batchconvstyle(in_channels=16, out_channels=16, style_channels=32, sz=3)
    N, H, W = 2, 16, 16
    Cin = Cout = 16        # spec's `x + feat` broadcast requires in == out channels
    S = 32                 # style_channels
    sz = 3

    key = jax.random.PRNGKey(0)
    kp, kx, ks = jax.random.split(key, 3)
    params = make_params(kp, Cin, Cout, S, sz)
    params["bw"] = make_banded_weight(params["w"], W)   # done once per weight set

    x = jax.random.normal(kx, (N, H, W, Cin), jnp.float32)    # NHWC
    style = jax.random.normal(ks, (N, S), jnp.float32)

    out = batchconvstyle_apply(params, style, x)
    out = jax.block_until_ready(out)
    assert out.shape == (N, H, W, Cout)

    # Check against a reference matching the kernel's quantization points (bf16
    # activation input + bf16 conv operands, f32 accumulation), then a looser check
    # against the all-f32 reference documenting the bf16 quantization cost.
    ref_bf16 = ref_batchconvstyle(params, style, x, conv_dtype=jnp.bfloat16,
                                  quantize_input=True)
    np.testing.assert_allclose(np.asarray(out), np.asarray(ref_bf16),
                               rtol=1e-2, atol=1e-2)
    ref_f32 = ref_batchconvstyle(params, style, x, conv_dtype=jnp.float32)
    np.testing.assert_allclose(np.asarray(out), np.asarray(ref_f32),
                               rtol=3e-2, atol=3e-2)

    print("KERNEL_OK")
</pallas_src>

<mosaic_0001>
module attributes {stable_mosaic.version = 11 : i64} {
  func.func @_batchconvstyle_kernel(%arg0: i32, %arg1: memref<1x16x256xbf16, #tpu.memory_space<vmem>>, %arg2: memref<1x256xf32, #tpu.memory_space<vmem>>, %arg3: memref<1x1x256xf32, #tpu.memory_space<vmem>>, %arg4: memref<768x256xbf16, #tpu.memory_space<vmem>>, %arg5: memref<1x256xf32, #tpu.memory_space<vmem>>, %arg6: memref<1x16x256xf32, #tpu.memory_space<vmem>>, %arg7: memref<18x256xbf16, #tpu.memory_space<vmem>>) attributes {dimension_semantics = [#tpu.dimension_semantics<parallel>], iteration_bounds = array<i64: 2>, scalar_prefetch = 0 : i64, scratch_operands = 1 : i64, tpu.core_type = #tpu.core_type<tc>, window_params = [{transform_indices = @transform_0, window_bounds = array<i64: 1, 16, 256>}, {pipeline_mode = #tpu.pipeline_mode<synchronous>, transform_indices = @transform_1, window_bounds = array<i64: 1, 256>}, {transform_indices = @transform_2, window_bounds = array<i64: 1, 1, 256>}, {pipeline_mode = #tpu.pipeline_mode<synchronous>, transform_indices = @transform_3, window_bounds = array<i64: 768, 256>}, {pipeline_mode = #tpu.pipeline_mode<synchronous>, transform_indices = @transform_4, window_bounds = array<i64: 1, 256>}, {transform_indices = @transform_5, window_bounds = array<i64: 1, 16, 256>}]} {
    %c0 = arith.constant 0 : index
    %c0_0 = arith.constant 0 : index
    %c0_1 = arith.constant 0 : index
    %0 = vector.load %arg1[%c0, %c0_0, %c0_1] : memref<1x16x256xbf16, #tpu.memory_space<vmem>>, vector<1x16x256xbf16>
    %1 = vector.shape_cast %0 : vector<1x16x256xbf16> to vector<16x256xbf16>
    %2 = arith.extf %1 : vector<16x256xbf16> to vector<16x256xf32>
    %c0_2 = arith.constant 0 : index
    %c0_3 = arith.constant 0 : index
    %3 = vector.load %arg2[%c0_2, %c0_3] : memref<1x256xf32, #tpu.memory_space<vmem>>, vector<1x256xf32>
    %4 = vector.broadcast %3 : vector<1x256xf32> to vector<16x256xf32>
    %5 = arith.mulf %2, %4 : vector<16x256xf32>
    %c0_4 = arith.constant 0 : index
    %c0_5 = arith.constant 0 : index
    %c0_6 = arith.constant 0 : index
    %6 = vector.load %arg3[%c0_4, %c0_5, %c0_6] : memref<1x1x256xf32, #tpu.memory_space<vmem>>, vector<1x1x256xf32>
    %7 = vector.shape_cast %6 : vector<1x1x256xf32> to vector<1x256xf32>
    %8 = vector.broadcast %7 : vector<1x256xf32> to vector<16x256xf32>
    %9 = arith.addf %5, %8 : vector<16x256xf32>
    %cst = arith.constant 0.000000e+00 : f32
    %10 = vector.broadcast %cst : f32 to vector<16x256xf32>
    %11 = arith.maximumf %9, %10 : vector<16x256xf32>
    %cst_7 = arith.constant 0.000000e+00 : bf16
    %12 = vector.broadcast %cst_7 : bf16 to vector<1x256xbf16>
    %c0_8 = arith.constant 0 : index
    %c0_9 = arith.constant 0 : index
    %13 = vector.load %arg7[%c0_8, %c0_9] : memref<18x256xbf16, #tpu.memory_space<vmem>>, vector<1x256xbf16>
    tpu.vector_store %arg7[%c0_8, %c0_9], %12 {strides = array<i32>} : memref<18x256xbf16, #tpu.memory_space<vmem>>, vector<1x256xbf16>,
    %cst_10 = arith.constant 0.000000e+00 : bf16
    %14 = vector.broadcast %cst_10 : bf16 to vector<1x256xbf16>
    %c17 = arith.constant 17 : index
    %c0_11 = arith.constant 0 : index
    %15 = vector.load %arg7[%c17, %c0_11] : memref<18x256xbf16, #tpu.memory_space<vmem>>, vector<1x256xbf16>
    tpu.vector_store %arg7[%c17, %c0_11], %14 {strides = array<i32>} : memref<18x256xbf16, #tpu.memory_space<vmem>>, vector<1x256xbf16>,
    %16 = arith.truncf %11 : vector<16x256xf32> to vector<16x256xbf16>
    %c1 = arith.constant 1 : index
    %c0_12 = arith.constant 0 : index
    %17 = vector.load %arg7[%c1, %c0_12] : memref<18x256xbf16, #tpu.memory_space<vmem>>, vector<16x256xbf16>
    tpu.vector_store %arg7[%c1, %c0_12], %16 {strides = array<i32>} : memref<18x256xbf16, #tpu.memory_space<vmem>>, vector<16x256xbf16>,
    %c0_13 = arith.constant 0 : index
    %c0_14 = arith.constant 0 : index
    %18 = vector.load %arg7[%c0_13, %c0_14] : memref<18x256xbf16, #tpu.memory_space<vmem>>, vector<16x256xbf16>
    %c1_15 = arith.constant 1 : index
    %c0_16 = arith.constant 0 : index
    %19 = vector.load %arg7[%c1_15, %c0_16] : memref<18x256xbf16, #tpu.memory_space<vmem>>, vector<16x256xbf16>
    %c2 = arith.constant 2 : index
    %c0_17 = arith.constant 0 : index
    %20 = vector.load %arg7[%c2, %c0_17] : memref<18x256xbf16, #tpu.memory_space<vmem>>, vector<16x256xbf16>
    %21 = tpu.concatenate %18, %19, %20 in 1 : vector<16x256xbf16>, vector<16x256xbf16>, vector<16x256xbf16> -> vector<16x768xbf16>
    %c0_18 = arith.constant 0 : index
    %c0_19 = arith.constant 0 : index
    %22 = vector.load %arg4[%c0_18, %c0_19] : memref<768x256xbf16, #tpu.memory_space<vmem>>, vector<768x256xbf16>
    %cst_20 = arith.constant dense<0.000000e+00> : vector<16x256xf32>
    %23 = tpu.matmul %21, %22, %cst_20 {dimension_numbers = #tpu.dot_dimension_numbers<[1], [0], [0], [1], [0, 0, 1, 1], [], []>} : vector<16x768xbf16>, vector<768x256xbf16>, vector<16x256xf32> -> vector<16x256xf32>
    %c0_21 = arith.constant 0 : index
    %c0_22 = arith.constant 0 : index
    %24 = vector.load %arg5[%c0_21, %c0_22] : memref<1x256xf32, #tpu.memory_space<vmem>>, vector<1x256xf32>
    %25 = vector.broadcast %24 : vector<1x256xf32> to vector<16x256xf32>
    %26 = arith.addf %23, %25 : vector<16x256xf32>
    %c0_23 = arith.constant 0 : index
    %c0_24 = arith.constant 0 : index
    %c0_25 = arith.constant 0 : index
    %27 = vector.load %arg6[%c0_23, %c0_24, %c0_25] : memref<1x16x256xf32, #tpu.memory_space<vmem>>, vector<1x16x256xf32>
    %28 = vector.shape_cast %27 : vector<1x16x256xf32> to vector<16x256xf32>
    %29 = vector.shape_cast %26 : vector<16x256xf32> to vector<1x16x256xf32>
    tpu.vector_store %arg6[%c0_23, %c0_24, %c0_25], %29 {strides = array<i32>} : memref<1x16x256xf32, #tpu.memory_space<vmem>>, vector<1x16x256xf32>,
    return
  }
  func.func @transform_0(%arg0: i32) -> (i32, i32, i32) {
    %c0_i32 = arith.constant 0 : i32
    %c0_i32_0 = arith.constant 0 : i32
    %c0_i32_1 = arith.constant 0 : i32
    return %arg0, %c0_i32, %c0_i32_0 : i32, i32, i32
  }
  func.func @transform_1(%arg0: i32) -> (i32, i32) {
    %c0_i32 = arith.constant 0 : i32
    %c0_i32_0 = arith.constant 0 : i32
    %c0_i32_1 = arith.constant 0 : i32
    return %c0_i32, %c0_i32_0 : i32, i32
  }
  func.func @transform_2(%arg0: i32) -> (i32, i32, i32) {
    %c0_i32 = arith.constant 0 : i32
    %c0_i32_0 = arith.constant 0 : i32
    %c0_i32_1 = arith.constant 0 : i32
    return %arg0, %c0_i32, %c0_i32_0 : i32, i32, i32
  }
  func.func @transform_3(%arg0: i32) -> (i32, i32) {
    %c0_i32 = arith.constant 0 : i32
    %c0_i32_0 = arith.constant 0 : i32
    %c0_i32_1 = arith.constant 0 : i32
    return %c0_i32, %c0_i32_0 : i32, i32
  }
  func.func @transform_4(%arg0: i32) -> (i32, i32) {
    %c0_i32 = arith.constant 0 : i32
    %c0_i32_0 = arith.constant 0 : i32
    %c0_i32_1 = arith.constant 0 : i32
    return %c0_i32, %c0_i32_0 : i32, i32
  }
  func.func @transform_5(%arg0: i32) -> (i32, i32, i32) {
    %c0_i32 = arith.constant 0 : i32
    %c0_i32_0 = arith.constant 0 : i32
    %c0_i32_1 = arith.constant 0 : i32
    return %arg0, %c0_i32, %c0_i32_0 : i32, i32, i32
  }
}

</mosaic_0001>

<bundles_post_ra>
// kernel: batchconvstyle_apply.1
= control target key start
LH: loop header
LB: loop body
LE: loop exit
PB: predicated region body
PF: predicated region fallthrough
CT: control target
= control target key end

     0   :  { %s1507_s18 = smov 0   ;;  %s1916_s0 = inlined_call_operand.vmem [shape: bf16[2,16,256], index: 0, kind: input, shape index: {}]   ;;  %s1917_s1 = inlined_call_operand.vmem [shape: f32[1,256], index: 1, kind: input, shape index: {}]   ;;  %s1918_s2 = inlined_call_operand.vmem [shape: f32[2,1,256], index: 2, kind: input, shape index: {}]   ;;  %s1919_s3 = inlined_call_operand.vmem [shape: bf16[768,256], index: 3, kind: input, shape index: {}]   ;;  %s1920_s4 = inlined_call_operand.vmem [shape: f32[1,256], index: 4, kind: input, shape index: {}]   ;;  %s1921_s5 = inlined_call_operand.vmem [shape: f32[2,16,256], index: 5, kind: output, shape index: {}]  }
   0x1 LB: > { %s1195_s19 = sadd.s32 4294967295, %s1475_s18   ;;  %p1199_p0 = scmp.ge.s32.totalorder %s1475_s18, 1  ;;  %s1475_s18 = sphi %s1507_s18, %s15_s18  }
   0x2   : > { %p196_p1 = scmp.lt.s32.totalorder %s1475_s18, 3 }
   0x4   : > { %p197_p2 = pnand %p1199_p0, %p196_p1 }
   0x5   : > { %p228_p3 = scmp.lt.s32.totalorder (!%p197_p2), %s1195_s19, 1 }
   0x6   : > { %200 = sbr.rel (%p197_p2) target bundleno = 342 (0x156), region = 40 }
   0xb   : > { %v1323_v0 = vld [vmem:[%s1919_s3 + $0x74] ss:$8 sps:$4 sm:$0xff]   ;;  %v1325_v1 = vld [vmem:[%s1919_s3 + $0x70] ss:$8 sps:$4 sm:$0xff]   ;;  %v1329_v4 = vld [vmem:[%s1919_s3 + $0x64] ss:$8 sps:$4 sm:$0xff]   ;;  %v251_v36 = vlaneseq }
   0xc   : > { %995 = vmatprep.subr.bf16.mxu0 %v1323_v0  ;;  %v1326_v2 = vld [vmem:[%s1919_s3 + $0x174] ss:$8 sps:$4 sm:$0xff]   ;;  %v1328_v3 = vld [vmem:[%s1919_s3 + $0x170] ss:$8 sps:$4 sm:$0xff]   ;;  %v1331_v5 = vld [vmem:[%s1919_s3 + $0x60] ss:$8 sps:$4 sm:$0xff]  }
   0xd   : > { %996 = vmatpush1.bf16.msra.mxu0 %v1325_v1  ;;  %1038 = vmatprep.subr.bf16.mxu1 %v1326_v2  ;;  %v1332_v6 = vld [vmem:[%s1919_s3 + $0x164] ss:$8 sps:$4 sm:$0xff]   ;;  %v1334_v7 = vld [vmem:[%s1919_s3 + $0x160] ss:$8 sps:$4 sm:$0xff]   ;;  %v1335_v8 = vld [vmem:[%s1919_s3 + $0x54] ss:$8 sps:$4 sm:$0xff]  }
   0xe   : > { %1039 = vmatpush1.bf16.msra.mxu1 %v1328_v3  ;;  %997 = vmatprep.subr.bf16.mxu0 %v1329_v4  ;;  %v1337_v9 = vld [vmem:[%s1919_s3 + $0x50] ss:$8 sps:$4 sm:$0xff]   ;;  %v1338_v10 = vld [vmem:[%s1919_s3 + $0x154] ss:$8 sps:$4 sm:$0xff]   ;;  %v1341_v11 = vld [vmem:[%s1919_s3 + $0x44] ss:$8 sps:$4 sm:$0xff]  }
   0xf   : > { %1040 = vmatprep.subr.bf16.mxu1 %v1332_v6  ;;  %v1340_v12 = vld [vmem:[%s1919_s3 + $0x150] ss:$8 sps:$4 sm:$0xff]   ;;  %v1344_v13 = vld [vmem:[%s1919_s3 + $0x144] ss:$8 sps:$4 sm:$0xff]   ;;  %v1343_v14 = vld [vmem:[%s1919_s3 + $0x40] ss:$8 sps:$4 sm:$0xff]  }
  0x10   : > { %v1347_v15 = vld [vmem:[%s1919_s3 + $0x34] ss:$8 sps:$4 sm:$0xff]   ;;  %v1346_v16 = vld [vmem:[%s1919_s3 + $0x140] ss:$8 sps:$4 sm:$0xff]   ;;  %v1349_v18 = vld [vmem:[%s1919_s3 + $0x30] ss:$8 sps:$4 sm:$0xff]  }
  0x11   : > { %998 = vmatpush1.bf16.msra.mxu0 %v1331_v5  ;;  %v1350_v17 = vld [vmem:[%s1919_s3 + $0x134] ss:$8 sps:$4 sm:$0xff]   ;;  %v1353_v19 = vld [vmem:[%s1919_s3 + $0x24] ss:$8 sps:$4 sm:$0xff]   ;;  %v1352_v20 = vld [vmem:[%s1919_s3 + $0x130] ss:$8 sps:$4 sm:$0xff]  }
  0x12   : > { %999 = vmatprep.subr.bf16.mxu0 %v1335_v8  ;;  %1041 = vmatpush1.bf16.msra.mxu1 %v1334_v7  ;;  %v1356_v21 = vld [vmem:[%s1919_s3 + $0x124] ss:$8 sps:$4 sm:$0xff]   ;;  %v1355_v22 = vld [vmem:[%s1919_s3 + $0x20] ss:$8 sps:$4 sm:$0xff]   ;;  %v1359_v23 = vld [vmem:[%s1919_s3 + $0x14] ss:$8 sps:$4 sm:$0xff]  }
  0x13   : > { %1042 = vmatprep.subr.bf16.mxu1 %v1338_v10  ;;  %v1358_v24 = vld [vmem:[%s1919_s3 + $0x120] ss:$8 sps:$4 sm:$0xff]   ;;  %v1362_v25 = vld [vmem:[%s1919_s3 + $0x114] ss:$8 sps:$4 sm:$0xff]   ;;  %v1361_v26 = vld [vmem:[%s1919_s3 + $0x10] ss:$8 sps:$4 sm:$0xff]  }
  0x14   : > { %v1365_v27 = vld [vmem:[%s1919_s3 + $0x4] ss:$8 sps:$4 sm:$0xff]   ;;  %v1364_v28 = vld [vmem:[%s1919_s3 + $0x110] ss:$8 sps:$4 sm:$0xff]   ;;  %v1367_v30 = vld [vmem:[%s1919_s3] ss:$8 sps:$4 sm:$0xff]  }
  0x15   : > { %1000 = vmatpush1.bf16.msra.mxu0 %v1337_v9  ;;  %v1368_v29 = vld [vmem:[%s1919_s3 + $0x104] ss:$8 sps:$4 sm:$0xff]   ;;  %v1371_v31 = vld [vmem:[%s1919_s3 + $0xf4] ss:$8 sps:$4 sm:$0xff]   ;;  %v1370_v32 = vld [vmem:[%s1919_s3 + $0x100] ss:$8 sps:$4 sm:$0xff]  }
  0x16   : > { %1001 = vmatprep.subr.bf16.mxu0 %v1341_v11  ;;  %1043 = vmatpush1.bf16.msra.mxu1 %v1340_v12  ;;  %v1374_v33 = vld [vmem:[%s1919_s3 + $0x1f4] ss:$8 sps:$4 sm:$0xff]   ;;  %v1373_v34 = vld [vmem:[%s1919_s3 + $0xf0] ss:$8 sps:$4 sm:$0xff]   ;;  %v1377_v35 = vld [vmem:[%s1919_s3 + $0xe4] ss:$8 sps:$4 sm:$0xff]  }
  0x17   : > { %1044 = vmatprep.subr.bf16.mxu1 %v1344_v13  ;;  %s1935_s19 = smov (!%p228_p3, %s1195_s19), 1  ;;  %v1376_v37 = vld [vmem:[%s1919_s3 + $0x1f0] ss:$8 sps:$4 sm:$0xff]   ;;  %v1380_v38 = vld [vmem:[%s1919_s3 + $0x1e4] ss:$8 sps:$4 sm:$0xff]   ;;  %v252_v41 = vshrl.u32 %v251_v36, 7 }
  0x18   : > { %v1379_v39 = vld [vmem:[%s1919_s3 + $0xe0] ss:$8 sps:$4 sm:$0xff]   ;;  %v1383_v40 = vld [vmem:[%s1919_s3 + $0xd4] ss:$8 sps:$4 sm:$0xff]   ;;  %s1311_s6 = sshll.u32 %s1935_s19, 4  ;;  %s1202_s9 = sshll.u32 %s1935_s19, 1 }
  0x19   : > { %1002 = vmatpush1.bf16.msra.mxu0 %v1343_v14  ;;  %v1382_v42 = vld [vmem:[%s1919_s3 + $0x1e0] ss:$8 sps:$4 sm:$0xff]   ;;  %v1386_v43 = vld [vmem:[%s1919_s3 + $0x1d4] ss:$8 sps:$4 sm:$0xff]   ;;  %vm286_vm0 = vsmask.f32 256  ;;  %s232_s20 = scalar_lea.vmem %s1916_s0, %s1311_s6  ;;  %s236_s25 = scalar_lea.vmem %s1918_s2, %s1202_s9 }
  0x1a   : > { %1003 = vmatprep.subr.bf16.mxu0 %v1347_v15  ;;  %1045 = vmatpush1.bf16.msra.mxu1 %v1346_v16  ;;  %v1385_v44 = vld [vmem:[%s1919_s3 + $0xd0] ss:$8 sps:$4 sm:$0xff]   ;;  %v1389_v46 = vld [vmem:[%s1919_s3 + $0xc4] ss:$8 sps:$4 sm:$0xff]   ;;  %v1664_v47 = vsub.s32 0, %v252_v41  ;;  %v1666_v48 = vsub.s32 1, %v252_v41 }
  0x1b   : > { %1046 = vmatprep.subr.bf16.mxu1 %v1350_v17  ;;  %v1388_v45 = vld [vmem:[%s1919_s3 + $0x1d0] ss:$8 sps:$4 sm:$0xff]   ;;  %v1391_v49 = vld [vmem:[%s1919_s3 + $0xc0] ss:$8 sps:$4 sm:$0xff]   ;;  %vm289_vm1 = vsmask.f32 4352 }
  0x1c   : > { %v1392_v50 = vld [vmem:[%s1919_s3 + $0x1c4] ss:$8 sps:$4 sm:$0xff]   ;;  %vm285_vm2 = vcmask 1040384   ;;  %vm288_vm3 = vcmask 1044484   ;;  %v1394_v53 = vld [vmem:[%s1919_s3 + $0x1c0] ss:$8 sps:$4 sm:$0xff]  }
  0x1d   : > { %1004 = vmatpush1.bf16.msra.mxu0 %v1349_v18  ;;  %v243_v51 = vld [vmem:[%s232_s20] sm:$0xff]  ;;  %v244_v52 = vld [vmem:[%s232_s20 + $0x8] sm:$0xff]  ;;  %vm1682_vm4 = vmand %vm285_vm2, %vm286_vm0  ;;  %vm295_vm7 = vsmask.f32 7938  ;;  %vm297_vm8 = vsmask.f32 7954 }
  0x1e   : > { %1005 = vmatprep.subr.bf16.mxu0 %v1353_v19  ;;  %1047 = vmatpush1.bf16.msra.mxu1 %v1352_v20  ;;  %v245_v54 = vunpack.c.l.bf16 %v243_v51  ;;  %v246_v55 = vunpack.c.h.bf16 %v243_v51  ;;  %v247_v56 = vunpack.c.l.bf16 %v244_v52  ;;  %v248_v57 = vunpack.c.h.bf16 %v244_v52  ;;  %v249_v58 = vld [vmem:[%s1917_s1] sm:$0x3]  ;;  %v1395_v61 = vld [vmem:[%s1919_s3 + $0xb4] ss:$8 sps:$4 sm:$0xff]   ;;  %vm1695_vm5 = vmand %vm288_vm3, %vm289_vm1  ;;  %s1312_s15 = sshll.u32 %s1935_s19, 5 }
  0x1f   : > { %1048 = vmatprep.subr.bf16.mxu1 %v1356_v21  ;;  %v265_v59 = vld [vmem:[%s236_s25] sm:$0x3]  ;;  %v254_v62 = vrot.slane %v249_v58, %v1664_v47  ;;  %v258_v63 = vrot.slane %v249_v58, %v1666_v48  ;;  %v292_v3 = vld [vmem:[#allocation2 + $0x8] sm:$0x11]  ;;  %vm291_vm6 = vmor %vm1695_vm5, %vm1682_vm4  ;;  %vm335_vm11 = vcmask 1043456   ;;  %vm337_vm12 = vcmask 1047556   ;;  %s241_s20 = scalar_lea.vmem %s1921_s5, %s1312_s15 }
  0x20   : > { %v270_v0 = vrot.slane %v265_v59, %v1664_v47  ;;  %v274_v1 = vrot.slane %v265_v59, %v1666_v48  ;;  %v1397_v4 = vld [vmem:[%s1919_s3 + $0xb0] ss:$8 sps:$4 sm:$0xff]   ;;  %v1398_v5 = vld [vmem:[%s1919_s3 + $0x1b4] ss:$8 sps:$4 sm:$0xff]   ;;  %v1401_v11 = vld [vmem:[%s1919_s3 + $0xa4] ss:$8 sps:$4 sm:$0xff]  }
  0x21   : > { %1006 = vmatpush1.bf16.msra.mxu0 %v1355_v22  ;;  %v261_v6 = vmul.f32 %v254_v62, %v245_v54  ;;  %v262_v7 = vmul.f32 %v258_v63, %v246_v55  ;;  %v263_v8 = vmul.f32 %v254_v62, %v247_v56  ;;  %v264_v9 = vmul.f32 %v258_v63, %v248_v57  ;;  %v1400_v10 = vld [vmem:[%s1919_s3 + $0x1b0] ss:$8 sps:$4 sm:$0xff]   ;;  %v1404_v13 = vld [vmem:[%s1919_s3 + $0x1a4] ss:$8 sps:$4 sm:$0xff]   ;;  %vm1725_vm9 = vmand %vm285_vm2, %vm295_vm7 }
  0x22   : > { %1007 = vmatprep.subr.bf16.mxu0 %v1359_v23  ;;  %1049 = vmatpush1.bf16.msra.mxu1 %v1358_v24  ;;  %v293_v12 = vsel %vm291_vm6, 0, %v292_v3  ;;  %vm1731_vm10 = vmand %vm288_vm3, %vm297_vm8  ;;  %v300_v20 = vld [vmem:[#allocation2] sm:$0x11]  ;;  %vm313_vm14 = vsmask.f32 4368 }
  0x23   : > { %1050 = vmatprep.subr.bf16.mxu1 %v1362_v25  ;;  %v277_v14 = vadd.f32 %v270_v0, %v261_v6  ;;  %v278_v15 = vadd.f32 %v274_v1, %v262_v7  ;;  %v279_v16 = vadd.f32 %v270_v0, %v263_v8  ;;  %v280_v17 = vadd.f32 %v274_v1, %v264_v9  ;;  %v1403_v25 = vld [vmem:[%s1919_s3 + $0xa0] ss:$8 sps:$4 sm:$0xff]   ;;  %vm299_vm13 = vmor %vm1731_vm10, %vm1725_vm9  ;;  %v1421_v55 = vld [vmem:[%s1919_s3 + $0x274] ss:$8 sps:$4 sm:$0xff]  }
  0x24   : > { %294 = vst [vmem:[#allocation2 + $0x8] sm:$0x11] %v293_v12  ;;  %vm1753_vm15 = vmand %vm335_vm11, %vm295_vm7  ;;  %v1415_v51 = vld [vmem:[%s1919_s3 + $0x80] ss:$8 sps:$4 sm:$0xff]   ;;  %v1426_v63 = vld [vmem:[%s1919_s3 + $0x264] ss:$8 sps:$4 sm:$0xff]  }
  0x25   : > { %1008 = vmatpush1.bf16.msra.mxu0 %v1361_v26  ;;  %v281_v21 = vmax.f32 %v277_v14, 0.0  ;;  %v282_v22 = vmax.f32 %v278_v15, 0.0  ;;  %v283_v23 = vmax.f32 %v279_v16, 0.0  ;;  %v284_v24 = vmax.f32 %v280_v17, 0.0  ;;  %v1406_v26 = vld [vmem:[%s1919_s3 + $0x1a0] ss:$8 sps:$4 sm:$0xff]   ;;  %vm1762_vm1 = vmand %vm337_vm12, %vm297_vm8 }
  0x26   : > { %1009 = vmatprep.subr.bf16.mxu0 %v1365_v27  ;;  %1051 = vmatpush1.bf16.msra.mxu1 %v1364_v28  ;;  %v1407_v27 = vld [vmem:[%s1919_s3 + $0x94] ss:$8 sps:$4 sm:$0xff]   ;;  %vm314_vm2 = vmor %vm286_vm0, %vm313_vm14  ;;  %v1418_v54 = vld [vmem:[%s1919_s3 + $0x180] ss:$8 sps:$4 sm:$0xff]   ;;  %vm398_vm0 = vcmask 1046528  }
  0x27   : > { %1052 = vmatprep.subr.bf16.mxu1 %v1368_v29  ;;  %v1313_v28 = vpack.c.bf16 %v282_v22, %v281_v21  ;;  %v1314_v29 = vpack.c.bf16 %v284_v24, %v283_v23  ;;  %vm339_vm3 = vmor %vm1762_vm1, %vm1753_vm15  ;;  %v1424_v60 = vld [vmem:[%s1919_s3 + $0x260] ss:$8 sps:$4 sm:$0xff]   ;;  %v1429_v3 = vld [vmem:[%s1919_s3 + $0x254] ss:$8 sps:$4 sm:$0xff]   ;;  %vm366_vm4 = vsmask.f32 7424 }
  0x28   : > { %v1427_v9 = vld [vmem:[%s1919_s3 + $0x250] ss:$8 sps:$4 sm:$0xff]   ;;  %v1432_v12 = vld [vmem:[%s1919_s3 + $0x244] ss:$8 sps:$4 sm:$0xff]   ;;  %v1430_v21 = vld [vmem:[%s1919_s3 + $0x240] ss:$8 sps:$4 sm:$0xff]  }
  0x29   : > { %1010 = vmatpush1.bf16.msra.mxu0 %v1367_v30  ;;  %v1409_v30 = vld [vmem:[%s1919_s3 + $0x90] ss:$8 sps:$4 sm:$0xff]   ;;  %v324_v36 = vshrl.u32 %v1314_v29, 16  ;;  %v1435_v22 = vld [vmem:[%s1919_s3 + $0x234] ss:$8 sps:$4 sm:$0xff]  }
  0x2a   : > { %1011 = vmatprep.subr.bf16.mxu0 %v1371_v31  ;;  %1053 = vmatpush1.bf16.msra.mxu1 %v1370_v32  ;;  %v301_v32 = vsel %vm299_vm13, 0, %v300_v20  ;;  %v1444_v31 = vld [vmem:[%s1919_s3 + $0x204] ss:$8 sps:$4 sm:$0xff]  }
  0x2b   : > { %1054 = vmatprep.subr.bf16.mxu1 %v1374_v33  ;;  %v1410_v33 = vld [vmem:[%s1919_s3 + $0x194] ss:$8 sps:$4 sm:$0xff]   ;;  %302 = vst [vmem:[#allocation2] sm:$0x11] %v301_v32  ;;  %v1442_v32 = vld [vmem:[%s1919_s3 + $0x200] ss:$8 sps:$4 sm:$0xff]  }
  0x2d   : > { %1012 = vmatpush2.bf16.msra.mxu0 %v1373_v34  ;;  %v316_v34 = vshrl.u32 %v1313_v28, 16 }
  0x2e   : > { %1013 = vmatprep.subr.bf16.mxu0 %v1377_v35  ;;  %1055 = vmatpush2.bf16.msra.mxu1 %v1376_v37  ;;  %v319_v35 = vshll.u32 %v1313_v28, 16  ;;  %v327_v37 = vshll.u32 %v1314_v29, 16  ;;  %v1436_v28 = vld [vmem:[%s1919_s3 + $0x220] ss:$8 sps:$4 sm:$0xff]   ;;  %v1441_v29 = vld [vmem:[%s1919_s3 + $0x214] ss:$8 sps:$4 sm:$0xff]  }
  0x2f   : > { %1056 = vmatprep.subr.bf16.mxu1 %v1380_v38  ;;  %v318_v41 = vrot.slane %v316_v34, 7  ;;  %v1445_v34 = vld [vmem:[%s1919_s3 + $0x2f0] ss:$8 sps:$4 sm:$0xff]  }
  0x30   : > { %v1451_v38 = vld [vmem:[%s1919_s3 + $0x2d0] ss:$8 sps:$4 sm:$0xff]  }
  0x31   : > { %1014 = vmatpush2.bf16.msra.mxu0 %v1379_v39  ;;  %v1412_v39 = vld [vmem:[%s1919_s3 + $0x190] ss:$8 sps:$4 sm:$0xff]  }
  0x32   : > { %1015 = vmatprep.subr.bf16.mxu0 %v1383_v40  ;;  %1057 = vmatpush2.bf16.msra.mxu1 %v1382_v42  ;;  %v1413_v40 = vld [vmem:[%s1919_s3 + $0x84] ss:$8 sps:$4 sm:$0xff]   ;;  %v326_v42 = vrot.slane %v324_v36, 7  ;;  %v1448_v36 = vld [vmem:[%s1919_s3 + $0x2e0] ss:$8 sps:$4 sm:$0xff]  }
  0x33   : > { %1058 = vmatprep.subr.bf16.mxu1 %v1386_v43  ;;  %v340_v43 = vld [vmem:[#allocation2 + $0x8] sm:$0xff]  ;;  %v344_v58 = vld [vmem:[#allocation2] sm:$0x11] }
  0x35   : > { %1016 = vmatpush2.bf16.msra.mxu0 %v1385_v44  ;;  %v1416_v44 = vld [vmem:[%s1919_s3 + $0x184] ss:$8 sps:$4 sm:$0xff]  }
  0x36   : > { %1017 = vmatprep.subr.bf16.mxu0 %v1389_v46  ;;  %1059 = vmatpush2.bf16.msra.mxu1 %v1388_v45  ;;  %v321_v45 = vor.u32 %v319_v35, %v318_v41  ;;  %v322_v46 = vrot.slane %v318_v41, 4  ;;  %v1450_v35 = vld [vmem:[%s1919_s3 + $0x2e4] ss:$8 sps:$4 sm:$0xff]   ;;  %v1459_v41 = vld [vmem:[%s1919_s3 + $0x2b4] ss:$8 sps:$4 sm:$0xff]  }
  0x37   : > { %1060 = vmatprep.subr.bf16.mxu1 %v1392_v50  ;;  %v331_v50 = vrot.slane %v326_v42, 4 }
  0x39   : > { %1018 = vmatpush2.bf16.msra.mxu0 %v1391_v49  ;;  %v329_v49 = vor.u32 %v327_v37, %v326_v42  ;;  %v345_v59 = vsel %vm291_vm6, %v331_v50, %v344_v58  ;;  %v1453_v37 = vld [vmem:[%s1919_s3 + $0x2d4] ss:$8 sps:$4 sm:$0xff]   ;;  %v1457_v42 = vld [vmem:[%s1919_s3 + $0x2b0] ss:$8 sps:$4 sm:$0xff]   ;;  %v1468_v50 = vld [vmem:[%s1919_s3 + $0x284] ss:$8 sps:$4 sm:$0xff]  }
  0x3a   : > { %1019 = vmatprep.subr.bf16.mxu0 %v1395_v61  ;;  %1061 = vmatpush2.bf16.msra.mxu1 %v1394_v53  ;;  %v341_v53 = vsel %vm339_vm3, %v321_v45, %v340_v43  ;;  %v1419_v61 = vld [vmem:[%s1919_s3 + $0x270] ss:$8 sps:$4 sm:$0xff]   ;;  %346 = vst [vmem:[#allocation2] sm:$0x11] %v345_v59  ;;  %v1462_v43 = vld [vmem:[%s1919_s3 + $0x2a4] ss:$8 sps:$4 sm:$0xff]  }
  0x3b   : > { %1062 = vmatprep.subr.bf16.mxu1 %v1398_v5  ;;  %v1784_v52 = vsel %vm314_vm2, %v322_v46, %v329_v49  ;;  %342 = vst [vmem:[#allocation2 + $0x8] sm:$0xff] %v341_v53  ;;  %v1465_v45 = vld [vmem:[%s1919_s3 + $0x294] ss:$8 sps:$4 sm:$0xff]   ;;  %v1463_v46 = vld [vmem:[%s1919_s3 + $0x290] ss:$8 sps:$4 sm:$0xff]  }
  0x3c   : > { %v1208_v56 = vcombine.high %v341_v53, %v1784_v52  ;;  %v1207_v57 = vcombine.low %v341_v53, %v1784_v52 }
  0x3d   : > { %1020 = vmatpush2.bf16.msra.mxu0 %v1397_v4 }
  0x3e   : > { %1021 = vmatprep.subr.bf16.mxu0 %v1401_v11  ;;  %1063 = vmatpush2.bf16.msra.mxu1 %v1400_v10  ;;  %v382_v62 = vshll.u32 %v1208_v56, 16  ;;  %v370_v0 = vshll.u32 %v1207_v57, 16  ;;  %v380_v1 = vshrl.u32 %v1208_v56, 16  ;;  %v368_v4 = vshrl.u32 %v1207_v57, 16 }
  0x3f   : > { %1064 = vmatprep.subr.bf16.mxu1 %v1404_v13  ;;  %1027 = vmatprep.mubr.bf16.mxu0 %v1208_v56  ;;  %v503_v56 = vld [vmem:[%s1920_s4] sm:$0x3] }
  0x40   : > { %v384_v2 = vrot.slane %v382_v62, 1  ;;  %v372_v5 = vrot.slane %v370_v0, 1  ;;  %v508_v59 = vrot.slane %v503_v56, %v1664_v47 }
  0x41   : > { %1022 = vmatpush2.bf16.msra.mxu0 %v1403_v25  ;;  %v349_v6 = vld [vmem:[#allocation2] sm:$0x11] }
  0x42   : > { %1023 = vmatprep.subr.bf16.mxu0 %v1407_v27  ;;  %1065 = vmatpush2.bf16.msra.mxu1 %v1406_v26  ;;  %v1210_v7 = vcombine.high %v349_v6, %v349_v6  ;;  %v1811_v8 = vcombine.low %v349_v6, %v349_v6  ;;  %v1816_v10 = vld [vmem:[#allocation2 + $0x8] sm:$0xee]  ;;  %v385_v11 = vor.u32 %v384_v2, %v380_v1  ;;  %v1433_v26 = vld [vmem:[%s1919_s3 + $0x230] ss:$8 sps:$4 sm:$0xff]  }
  0x43   : > { %1066 = vmatprep.subr.bf16.mxu1 %v1410_v33  ;;  %v1212_v13 = vcombine.high %v1816_v10, %v1784_v52  ;;  %v373_v15 = vor.u32 %v372_v5, %v368_v4  ;;  %v1438_v27 = vld [vmem:[%s1919_s3 + $0x224] ss:$8 sps:$4 sm:$0xff]   ;;  %v1447_v33 = vld [vmem:[%s1919_s3 + $0x2f4] ss:$8 sps:$4 sm:$0xff]   ;;  %v1211_v49 = vcombine.low %v1816_v10, %v1784_v52 }
  0x44   : > { %v387_v14 = vshll.u32 %v1210_v7, 16  ;;  %v375_v16 = vshll.u32 %v1811_v8, 16  ;;  %v403_v17 = vrot.slane %v1210_v7, 1 }
  0x45   : > { %1024 = vmatpush2.bf16.msra.mxu0 %v1409_v30  ;;  %v402_v18 = vrot.slane %v1212_v13, 1  ;;  %v1439_v30 = vld [vmem:[%s1919_s3 + $0x210] ss:$8 sps:$4 sm:$0xff]   ;;  %v399_v53 = vrot.slane %v1211_v49, 1 }
  0x46   : > { %1025 = vmatprep.subr.bf16.mxu0 %v1413_v40  ;;  %1067 = vmatpush2.bf16.msra.mxu1 %v1412_v39  ;;  %v389_v19 = vrot.slane %v387_v14, 1  ;;  %v377_v20 = vrot.slane %v375_v16, 1  ;;  %v1456_v39 = vld [vmem:[%s1919_s3 + $0x2c4] ss:$8 sps:$4 sm:$0xff]   ;;  %v1454_v40 = vld [vmem:[%s1919_s3 + $0x2c0] ss:$8 sps:$4 sm:$0xff]  }
  0x47   : > { %1068 = vmatprep.subr.bf16.mxu1 %v1416_v44  ;;  %v404_v23 = vsel %vm398_vm0, %v402_v18, %v403_v17  ;;  %v1460_v44 = vld [vmem:[%s1919_s3 + $0x2a0] ss:$8 sps:$4 sm:$0xff]  }
  0x48   : > { %v390_v24 = vsel %vm366_vm4, %v385_v11, %v389_v19  ;;  %v378_v25 = vsel %vm366_vm4, %v373_v15, %v377_v20 }
  0x49   : > { %1026 = vmatpush2.bf16.msra.mxu0 %v1415_v51  ;;  %1070 = vmatprep.mubr.bf16.mxu1 %v390_v24  ;;  %v1466_v51 = vld [vmem:[%s1919_s3 + $0x280] ss:$8 sps:$4 sm:$0xff]  }
  0x4a   : > { %1081 = vmatprep.subr.bf16.mxu0 %v1421_v55  ;;  %1069 = vmatpush2.bf16.msra.mxu1 %v1418_v54  ;;  %v400_v54 = vrot.slane %v1811_v8, 1 }
  0x4c   : > { %1028 = vmatmul.mubr.bf16.vlgmr.msra.gmra.mxu0 %v1207_v57  ;;  %v401_v55 = vsel %vm398_vm0, %v399_v53, %v400_v54 }
  0x4d   : > { %1082 = vmatpush1.bf16.msra.mxu0 %v1419_v61  ;;  %1113 = vmatprep.mubr.bf16.mxu0 %v404_v23  ;;  %v512_v61 = vrot.slane %v503_v56, %v1666_v48 }
  0x4e   : > { %1083 = vmatprep.subr.bf16.mxu0 %v1426_v63  ;;  %1071 = vmatmul.mubr.bf16.vlgmr.msra.gmra.mxu1 %v378_v25 }
  0x51   : > { %1084 = vmatpush1.bf16.msra.mxu0 %v1424_v60 }
  0x52   : > { %1085 = vmatprep.subr.bf16.mxu0 %v1429_v3 }
  0x55   : > { %1086 = vmatpush1.bf16.msra.mxu0 %v1427_v9 }
  0x56   : > { %1087 = vmatprep.subr.bf16.mxu0 %v1432_v12 }
  0x59   : > { %1088 = vmatpush1.bf16.msra.mxu0 %v1430_v21 }
  0x5a   : > { %1089 = vmatprep.subr.bf16.mxu0 %v1435_v22 }
  0x5d   : > { %1090 = vmatpush1.bf16.msra.mxu0 %v1433_v26 }
  0x5e   : > { %1091 = vmatprep.subr.bf16.mxu0 %v1438_v27 }
  0x61   : > { %1092 = vmatpush1.bf16.msra.mxu0 %v1436_v28 }
  0x62   : > { %1093 = vmatprep.subr.bf16.mxu0 %v1441_v29 }
  0x65   : > { %1094 = vmatpush1.bf16.msra.mxu0 %v1439_v30 }
  0x66   : > { %1095 = vmatprep.subr.bf16.mxu0 %v1444_v31 }
  0x69   : > { %1096 = vmatpush1.bf16.msra.mxu0 %v1442_v32 }
  0x6a   : > { %1097 = vmatprep.subr.bf16.mxu0 %v1447_v33 }
  0x6d   : > { %1098 = vmatpush2.bf16.msra.mxu0 %v1445_v34 }
  0x6e   : > { %1099 = vmatprep.subr.bf16.mxu0 %v1450_v35 }
  0x71   : > { %1100 = vmatpush2.bf16.msra.mxu0 %v1448_v36 }
  0x72   : > { %1101 = vmatprep.subr.bf16.mxu0 %v1453_v37 }
  0x75   : > { %1102 = vmatpush2.bf16.msra.mxu0 %v1451_v38 }
  0x76   : > { %1103 = vmatprep.subr.bf16.mxu0 %v1456_v39 }
  0x79   : > { %1104 = vmatpush2.bf16.msra.mxu0 %v1454_v40 }
  0x7a   : > { %1105 = vmatprep.subr.bf16.mxu0 %v1459_v41 }
  0x7d   : > { %1106 = vmatpush2.bf16.msra.mxu0 %v1457_v42 }
  0x7e   : > { %1107 = vmatprep.subr.bf16.mxu0 %v1462_v43 }
  0x81   : > { %1108 = vmatpush2.bf16.msra.mxu0 %v1460_v44 }
  0x82   : > { %1109 = vmatprep.subr.bf16.mxu0 %v1465_v45 }
  0x85   : > { %1110 = vmatpush2.bf16.msra.mxu0 %v1463_v46 }
  0x86   : > { %1111 = vmatprep.subr.bf16.mxu0 %v1468_v50 }
  0x89   : > { %1112 = vmatpush2.bf16.msra.mxu0 %v1466_v51 }
  0x8c   : > { %1114 = vmatmul.mubr.bf16.vlgmr.msra.gmra.mxu0 %v401_v55 }
 0x10c   : > { %v1029_v52 = vpop.f32.mrf.mxu0 }
 0x10d   : > { %v1030_v0 = vadd.f32 %v1029_v52, %v508_v59 }
 0x10e   : > { %v1031_v57 = vpop.f32.mrf.mxu0  ;;  %v1072_v58 = vpop.f32.mrf.mxu1 }
 0x10f   : > { %v1032_v60 = vadd.f32 %v1031_v57, %v512_v61  ;;  %v1073_v3 = vadd.f32 %v1072_v58, %v1030_v0 }
 0x110   : > { %v1033_v62 = vpop.f32.mrf.mxu0  ;;  %v1074_v63 = vpop.f32.mrf.mxu1 }
 0x111   : > { %v1034_v4 = vadd.f32 %v1033_v62, %v508_v59  ;;  %v1075_v6 = vadd.f32 %v1074_v63, %v1032_v60 }
 0x112   : > { %v1035_v1 = vpop.f32.mrf.mxu0  ;;  %v1076_v2 = vpop.f32.mrf.mxu1 }
 0x113   : > { %v1036_v7 = vadd.f32 %v1035_v1, %v512_v61  ;;  %v1077_v48 = vadd.f32 %v1076_v2, %v1034_v4 }
 0x114   : > { %v1078_v47 = vpop.f32.mrf.mxu1 }
 0x115   : > { %v1079_v12 = vadd.f32 %v1078_v47, %v1036_v7 }
 0x14c   : > { %v1115_v5 = vpop.f32.mrf.mxu0 }
 0x14d   : > { %v1116_v8 = vadd.f32 %v1115_v5, %v1073_v3 }
 0x14e   : > { %v1117_v9 = vpop.f32.mrf.mxu0 }
 0x14f   : > { %1124 = vst [vmem:[%s241_s20] sm:$0xff] %v1116_v8  ;;  %v1118_v10 = vadd.f32 %v1117_v9, %v1075_v6 }
 0x150   : > { %v1119_v11 = vpop.f32.mrf.mxu0 }
 0x151   : > { %1125 = vst [vmem:[%s241_s20 + $0x8] sm:$0xff] %v1118_v10  ;;  %v1120_v13 = vadd.f32 %v1119_v11, %v1077_v48 }
 0x152   : > { %v1121_v14 = vpop.f32.mrf.mxu0 }
 0x153   : > { %1126 = vst [vmem:[%s241_s20 + $0x10] sm:$0xff] %v1120_v13  ;;  %v1122_v15 = vadd.f32 %v1121_v14, %v1079_v12 }
 0x155   : > { %1127 = vst [vmem:[%s241_s20 + $0x18] sm:$0xff] %v1122_v15 }
 0x156 PF: > { %s15_s18 = sadd.s32 1, %s1475_s18  }
 0x157   : > { %p12_p4 = scmp.ge.s32.totalorder %s15_s18, 4  }
 0x159   :  { %14 = sbr.rel (!%p12_p4) target bundleno = 1 (0x1), region = 73 }

</bundles_post_ra>
